<compile_context>
chip_gen: v7x
topology: tpu7x:2x2x1
jax: 0.10.0
libtpu: 0.0.40
codegen_flags: <defaults>
</compile_context>

<pallas_src>
import jax
import jax.numpy as jnp
from jax.experimental import pallas as pl
from jax.experimental.pallas import tpu as pltpu


def time_encoding_kernel(t_ref, f_ref, out_ref):
    # t_ref: (tb, 1) f32, f_ref: (1, half) f32, out_ref: (tb, 2*half) out_dtype
    half = f_ref.shape[-1]
    prod = t_ref[...] * f_ref[...]                       # (tb, half), f32, VPU
    out_ref[:, :half] = jnp.sin(prod).astype(out_ref.dtype)
    out_ref[:, half:] = jnp.cos(prod).astype(out_ref.dtype)


def _round_up(x, m):
    return ((x + m - 1) // m) * m


def _pick_block_rows(batch, embed_dim, out_itemsize,
                     target_block_bytes=2 * 1024 * 1024):
    """Rows per grid step (multiple of 8).

    Sized so each step writes ~target_block_bytes of fused output (amortizes
    the ~0.35 us/step overhead; ref data shows >=512-row tiles reach ~85% of
    HBM roofline), capped at the batch size, and additionally capped so large
    batches keep >= ~8 grid steps (v7x shards the parallel axis over 2 TCs).
    Double-buffered (in + out) blocks stay far below the 32 MiB scoped VMEM
    limit on every chip.
    """
    row_bytes = embed_dim * out_itemsize + 4     # fused output row + f32 t row
    tb = max(8, target_block_bytes // max(row_bytes, 1))
    tb = min(tb, _round_up(batch, 8))            # never bigger than (rounded) batch
    min_steps = 8
    if batch >= min_steps * 8:                   # only matters for large batches
        tb = min(tb, _round_up(pl.cdiv(batch, min_steps), 8))
    return max(8, _round_up(tb, 8))


def time_encoding(t, freqs, out_dtype=jnp.float32):
    """t: (B,) float, freqs: (half,) float -> (B, 2*half) out_dtype."""
    t = jnp.asarray(t, jnp.float32)
    freqs = jnp.asarray(freqs, jnp.float32)
    B = t.shape[0]
    half = freqs.shape[0]
    embed_dim = 2 * half

    tb = _pick_block_rows(B, embed_dim, jnp.dtype(out_dtype).itemsize)
    grid = (pl.cdiv(B, tb),)                     # partial last block is masked

    out = pl.pallas_call(
        time_encoding_kernel,
        out_shape=jax.ShapeDtypeStruct((B, embed_dim), out_dtype),
        grid_spec=pltpu.PrefetchScalarGridSpec(
            num_scalar_prefetch=0,
            grid=grid,
            in_specs=[
                pl.BlockSpec((tb, 1), lambda i: (i, 0)),       # t rows follow grid
                pl.BlockSpec((1, half), lambda i: (0, 0)),     # freqs resident
            ],
            out_specs=pl.BlockSpec((tb, embed_dim), lambda i: (i, 0)),
        ),
        compiler_params=pltpu.CompilerParams(
            dimension_semantics=("parallel",),
            vmem_limit_bytes=32 * 1024 * 1024,
        ),
    )(t.reshape(B, 1), freqs.reshape(1, half))
    return out


if __name__ == "__main__":
    embed_dim = 32
    half = embed_dim // 2
    batch = 20  # deliberately not a multiple of 8: exercises the masked partial block

    # Deterministic parameter init, same formula as nn.Parameter in __init__.
    freqs = jnp.exp(jnp.linspace(0.0, 6.0, half)).astype(jnp.float32)

    # Deterministic example input.
    key = jax.random.PRNGKey(0)
    t = jax.random.uniform(key, (batch,), dtype=jnp.float32)

    out = time_encoding(t, freqs)
    out = jax.block_until_ready(out)

    # Reference check in plain JAX.
    prod = t[:, None] * freqs[None, :]
    ref = jnp.concatenate([jnp.sin(prod), jnp.cos(prod)], axis=-1)
    assert out.shape == (batch, embed_dim), out.shape
    assert jnp.allclose(out, ref, atol=1e-5, rtol=1e-5)

    print("KERNEL_OK")
</pallas_src>

<mosaic_0001>
module attributes {stable_mosaic.version = 11 : i64} {
  func.func @time_encoding_kernel(%arg0: i32, %arg1: memref<24x1xf32, #tpu.memory_space<vmem>>, %arg2: memref<1x16xf32, #tpu.memory_space<vmem>>, %arg3: memref<24x32xf32, #tpu.memory_space<vmem>>) attributes {dimension_semantics = [#tpu.dimension_semantics<parallel>], iteration_bounds = array<i64: 1>, scalar_prefetch = 0 : i64, scratch_operands = 0 : i64, tpu.core_type = #tpu.core_type<tc>, window_params = [{transform_indices = @transform_0, window_bounds = array<i64: 24, 1>}, {pipeline_mode = #tpu.pipeline_mode<synchronous>, transform_indices = @transform_1, window_bounds = array<i64: 1, 16>}, {transform_indices = @transform_2, window_bounds = array<i64: 24, 32>}]} {
    %c0 = arith.constant 0 : index
    %c0_0 = arith.constant 0 : index
    %0 = vector.load %arg1[%c0, %c0_0] : memref<24x1xf32, #tpu.memory_space<vmem>>, vector<24x1xf32>
    %c0_1 = arith.constant 0 : index
    %c0_2 = arith.constant 0 : index
    %1 = vector.load %arg2[%c0_1, %c0_2] : memref<1x16xf32, #tpu.memory_space<vmem>>, vector<1x16xf32>
    %2 = vector.broadcast %0 : vector<24x1xf32> to vector<24x16xf32>
    %3 = vector.broadcast %1 : vector<1x16xf32> to vector<24x16xf32>
    %4 = arith.mulf %2, %3 : vector<24x16xf32>
    %5 = math.sin %4 : vector<24x16xf32>
    %c0_3 = arith.constant 0 : index
    %c0_4 = arith.constant 0 : index
    %6 = vector.load %arg3[%c0_3, %c0_4] : memref<24x32xf32, #tpu.memory_space<vmem>>, vector<24x16xf32>
    tpu.vector_store %arg3[%c0_3, %c0_4], %5 {strides = array<i32>} : memref<24x32xf32, #tpu.memory_space<vmem>>, vector<24x16xf32>,
    %7 = math.cos %4 : vector<24x16xf32>
    %c0_5 = arith.constant 0 : index
    %c16 = arith.constant 16 : index
    %8 = vector.load %arg3[%c0_5, %c16] : memref<24x32xf32, #tpu.memory_space<vmem>>, vector<24x16xf32>
    tpu.vector_store %arg3[%c0_5, %c16], %7 {strides = array<i32>} : memref<24x32xf32, #tpu.memory_space<vmem>>, vector<24x16xf32>,
    return
  }
  func.func @transform_0(%arg0: i32) -> (i32, i32) {
    %c0_i32 = arith.constant 0 : i32
    %c0_i32_0 = arith.constant 0 : i32
    return %arg0, %c0_i32 : i32, i32
  }
  func.func @transform_1(%arg0: i32) -> (i32, i32) {
    %c0_i32 = arith.constant 0 : i32
    %c0_i32_0 = arith.constant 0 : i32
    %c0_i32_1 = arith.constant 0 : i32
    return %c0_i32, %c0_i32_0 : i32, i32
  }
  func.func @transform_2(%arg0: i32) -> (i32, i32) {
    %c0_i32 = arith.constant 0 : i32
    %c0_i32_0 = arith.constant 0 : i32
    return %arg0, %c0_i32 : i32, i32
  }
}

</mosaic_0001>

<bundles_post_ra>
// kernel: tpu_custom_call.1
= control target key start
LH: loop header
LB: loop body
LE: loop exit
PB: predicated region body
PF: predicated region fallthrough
CT: control target
= control target key end

     0   :  { %v783_v2 = vmov 0   ;;  %s1012_s0 = inlined_call_operand.vmem [shape: f32[20,1], index: 0, kind: input, shape index: {}]   ;;  %s1013_s1 = inlined_call_operand.vmem [shape: f32[1,16], index: 1, kind: input, shape index: {}]   ;;  %s1014_s2 = inlined_call_operand.hbm [shape: f32[20,32], index: 2, kind: output, shape index: {}]  }
   0x1   :  { %v14_v0 = vld [vmem:[%s1012_s0 + $0x10] sm:$0xff]  ;;  %v12_v1 = vld [vmem:[%s1012_s0] sm:$0xff]  ;;  %746 = vset.pattern.permute.xlu1 %v783_v2  ;;  %745 = vset.pattern.permute.xlu0 %v783_v2  ;;  %v13_v3 = vld [vmem:[%s1012_s0 + $0x8] sm:$0xff] }
   0x2   :  { %28 = vperm.xlu1 %746, %v14_v0   ;;  %18 = vperm.xlu0 %745, %v12_v1  }
   0x3   :  { %7 = vsyncpa [#allocation3], 0  ;;  %v697_v4 = vld [vmem:[%s1013_s1] ss:$0 sm:$0xff]  ;;  %v784_v38 = vmov 683565275  }
   0x4   :  { %v785_v40 = vmov 2475754826   ;;  %v786_v42 = vmov 2131351028   ;;  %v787_v44 = vmov 2102212464  }
   0x5   :  { %v788_v46 = vmov 920167782   ;;  %v789_v54 = vmov 1326507024   ;;  %s790_s0 = smov 16   ;;  %s791_s1 = smov [#allocation2]  }
   0x6   :  { %23 = vperm.xlu0 %745, %v13_v3   ;;  %s686_s17 = sshll.u32 %s791_s1, 4  ;;  %s687_s17 = int_to_ptr.vmem [resolvable:$true] %s686_s17 }
   0x7   :  { %s759_s18 = scalar_lea.vmem %s687_s17, 384  ;;  %p764_p1 = scmp.lt.s32.totalorder %s687_s17, %s687_s17 }
   0x8   :  { %p760_p0 = scmp.ne.s32.totalorder %s687_s17, %s759_s18  ;;  %p765_p2 = scmp.lt.s32.totalorder %s759_s18, %s759_s18 }
   0xa   :  { %p766_p3 = por %p765_p2, %p764_p1 }
   0xc   :  { %p767_p4 = pnand %p766_p3, %p760_p0 }
  0x81   :  { %v29_v5 = vpop.permute.xlu1 %28  ;;  %v19_v6 = vpop.permute.xlu0 %18 }
  0x82   :  { %v821_v7 = vmul.f32 %v697_v4, %v29_v5  ;;  %v823_v8 = vmul.f32 %v697_v4, %v19_v6 }
  0x84   :  { %v248_v9 = vand.u32 2147483647, %v821_v7  ;;  %v251_v10 = vand.u32 2139095040, %v821_v7  ;;  %v40_v11 = vand.u32 2147483647, %v823_v8  ;;  %v43_v12 = vand.u32 2139095040, %v823_v8 }
  0x85   :  { %v24_v13 = vpop.permute.xlu0 %23 }
  0x86   :  { %v252_v14 = vshrl.u32 %v251_v10, 23  ;;  %v829_v15 = vmul.f32 %v697_v4, %v24_v13  ;;  %v255_v16 = vand.u32 8388607, %v248_v9  ;;  %v44_v17 = vshrl.u32 %v43_v12, 23 }
  0x87   :  { %v47_v18 = vand.u32 8388607, %v40_v11 }
  0x88   :  { %v706_v19 = vadd.s32 4294967169, %v252_v14  ;;  %v698_v20 = vadd.s32 4294967169, %v44_v17  ;;  %v147_v21 = vand.u32 2139095040, %v829_v15  ;;  %v256_v23 = vor.u32 8388608, %v255_v16 }
  0x89   :  { %v48_v24 = vor.u32 8388608, %v47_v18  ;;  %v144_v32 = vand.u32 2147483647, %v829_v15 }
  0x8a   :  { %v258_v22 = vadd.s32 1, %v706_v19  ;;  %v50_v25 = vadd.s32 1, %v698_v20  ;;  %v148_v26 = vshrl.u32 %v147_v21, 23  ;;  %v837_v33 = vshll.u32 %v256_v23, 8 }
  0x8b   :  { %v841_v36 = vshll.u32 %v48_v24, 8 }
  0x8c   :  { %vm259_vm0 = vcmp.gt.s32.totalorder %v258_v22, 0  ;;  %vm51_vm1 = vcmp.gt.s32.totalorder %v50_v25, 0  ;;  %v702_v28 = vadd.s32 4294967169, %v148_v26 }
  0x8d   :  { %v260_v27 = vsel %vm259_vm0, %v258_v22, 0  ;;  %v52_v31 = vsel %vm51_vm1, %v50_v25, 0 }
  0x8e   :  { %v261_v29 = vshrl.u32 %v260_v27, 5  ;;  %v262_v30 = vand.u32 31, %v260_v27  ;;  %v839_v34 = vshrl.u32 %v52_v31, 5  ;;  %v54_v35 = vand.u32 31, %v52_v31 }
  0x8f   :  { %v848_v48 = vadd.s32 1, %v702_v28 }
  0x90   :  { %v263_v37 = vsub.s32 32, %v262_v30  ;;  %v265_v39 = vshll.u32 %v784_v38, %v262_v30  ;;  %v268_v41 = vshll.u32 %v785_v40, %v262_v30  ;;  %v271_v43 = vshll.u32 %v786_v42, %v262_v30 }
  0x91   :  { %v274_v45 = vshll.u32 %v787_v44, %v262_v30  ;;  %v277_v47 = vshll.u32 %v788_v46, %v262_v30  ;;  %vm280_vm2 = vcmp.lt.s32.totalorder %v261_v29, 1  ;;  %vm281_vm3 = vcmp.lt.s32.totalorder %v261_v29, 2 }
  0x92   :  { %v264_v49 = vshrl.u32 %v784_v38, %v263_v37  ;;  %v266_v50 = vshrl.u32 %v785_v40, %v263_v37  ;;  %v269_v51 = vshrl.u32 %v786_v42, %v263_v37  ;;  %v272_v52 = vshrl.u32 %v787_v44, %v263_v37 }
  0x93   :  { %v275_v53 = vshrl.u32 %v788_v46, %v263_v37  ;;  %v278_v55 = vshrl.u32 %v789_v54, %v263_v37  ;;  %vm282_vm4 = vcmp.lt.s32.totalorder %v261_v29, 3  ;;  %v55_v59 = vsub.s32 32, %v54_v35 }
  0x94   :  { %v267_v56 = vor.u32 %v266_v50, %v265_v39  ;;  %v270_v57 = vor.u32 %v269_v51, %v268_v41  ;;  %v273_v58 = vor.u32 %v272_v52, %v271_v43  ;;  %vm283_vm5 = vcmp.lt.s32.totalorder %v261_v29, 4 }
  0x95   :  { %v276_v60 = vor.u32 %v275_v53, %v274_v45  ;;  %v279_v61 = vor.u32 %v278_v55, %v277_v47  ;;  %v57_v62 = vshll.u32 %v784_v38, %v54_v35  ;;  %v60_v6 = vshll.u32 %v785_v40, %v54_v35 }
  0x96   :  { %v284_v63 = vsel %vm280_vm2, %v264_v49, %v267_v56  ;;  %v285_v0 = vsel %vm283_vm5, %v273_v58, 2102212464  ;;  %v288_v1 = vsel %vm280_vm2, %v267_v56, %v270_v57  ;;  %v292_v2 = vsel %vm280_vm2, %v270_v57, %v273_v58 }
  0x97   :  { %v286_v3 = vsel %vm282_vm4, %v270_v57, %v285_v0  ;;  %v289_v4 = vsel %vm283_vm5, %v276_v60, 920167782  ;;  %v293_v5 = vsel %vm283_vm5, %v279_v61, 1326507024  ;;  %v56_v13 = vshrl.u32 %v784_v38, %v55_v59 }
  0x98   :  { %v290_v10 = vsel %vm282_vm4, %v273_v58, %v289_v4  ;;  %v294_v12 = vsel %vm282_vm4, %v276_v60, %v293_v5  ;;  %v58_v14 = vshrl.u32 %v785_v40, %v55_v59  ;;  %v287_v16 = vsel %vm281_vm3, %v284_v63, %v286_v3 }
  0x99   :  { %v291_v17 = vsel %vm281_vm3, %v288_v1, %v290_v10  ;;  %v295_v18 = vsel %vm281_vm3, %v292_v2, %v294_v12  ;;  %v61_v19 = vshrl.u32 %v786_v42, %v55_v59  ;;  %v63_v26 = vshll.u32 %v786_v42, %v54_v35 }
  0x9a   :  { %v871_v20 = vmul.u32.u64.low %v837_v33, %v295_v18  ;;  %v872_v21 = vmul.u32.u64.high %v837_v33, %v295_v18, %v871_v20  ;;  %v875_v22 = vmul.u32.u64.low %v837_v33, %v291_v17  ;;  %v876_v23 = vmul.u32.u64.high %v837_v33, %v291_v17, %v875_v22 }
  0x9b   :  { %v59_v24 = vor.u32 %v58_v14, %v57_v62  ;;  %v62_v25 = vor.u32 %v61_v19, %v60_v6  ;;  %v64_v27 = vshrl.u32 %v787_v44, %v55_v59  ;;  %v303_v28 = vmul.u32 %v837_v33, %v287_v16 }
  0x9c   :  { %v66_v29 = vshll.u32 %v787_v44, %v54_v35  ;;  %v67_v30 = vshrl.u32 %v788_v46, %v55_v59  ;;  %v70_v31 = vshrl.u32 %v789_v54, %v55_v59  ;;  %v69_v39 = vshll.u32 %v788_v46, %v54_v35 }
  0x9d   :  { %v65_v37 = vor.u32 %v64_v27, %v63_v26  ;;  %vm72_vm6 = vcmp.lt.s32.totalorder %v839_v34, 1  ;;  %vm73_vm7 = vcmp.lt.s32.totalorder %v839_v34, 2  ;;  %vm305_vm8 = vc.u32 %v872_v21, %v875_v22 }
  0x9e   :  { %v306_v41 = vadd.s32 1, %v876_v23  ;;  %v68_v43 = vor.u32 %v67_v30, %v66_v29  ;;  %vm74_vm9 = vcmp.lt.s32.totalorder %v839_v34, 3  ;;  %v71_v33 = vor.u32 %v70_v31, %v69_v39 }
  0x9f   :  { %vm75_vm10 = vcmp.lt.s32.totalorder %v839_v34, 4  ;;  %v76_v45 = vsel %vm72_vm6, %v56_v13, %v59_v24  ;;  %v80_v47 = vsel %vm72_vm6, %v59_v24, %v62_v25  ;;  %v84_v51 = vsel %vm72_vm6, %v62_v25, %v65_v37 }
  0xa0   :  { %v307_v49 = vsel %vm305_vm8, %v306_v41, %v876_v23  ;;  %v77_v35 = vsel %vm75_vm10, %v65_v37, 2102212464  ;;  %v81_v50 = vsel %vm75_vm10, %v68_v43, 920167782  ;;  %v85_v56 = vsel %vm75_vm10, %v71_v33, 1326507024 }
  0xa1   :  { %v308_v52 = vadd.s32 %v307_v49, %v303_v28  ;;  %v78_v53 = vsel %vm74_vm9, %v62_v25, %v77_v35  ;;  %v82_v55 = vsel %vm74_vm9, %v65_v37, %v81_v50  ;;  %v86_v58 = vsel %vm74_vm9, %v68_v43, %v85_v56 }
  0xa2   :  { %v83_v57 = vsel %vm73_vm7, %v80_v47, %v82_v55  ;;  %v151_v59 = vand.u32 8388607, %v144_v32  ;;  %vm155_vm11 = vcmp.gt.s32.totalorder %v848_v48, 0  ;;  %v87_v61 = vsel %vm73_vm7, %v84_v51, %v86_v58 }
  0xa3   :  { %v309_v60 = vadd.s32 536870912, %v308_v52  ;;  %v902_v62 = vmul.u32.u64.low %v841_v36, %v83_v57  ;;  %v903_v63 = vmul.u32.u64.high %v841_v36, %v83_v57, %v902_v62  ;;  %v79_v0 = vsel %vm73_vm7, %v76_v45, %v78_v53 }
  0xa4   :  { %v909_v1 = vmul.u32.u64.low %v841_v36, %v87_v61  ;;  %v910_v2 = vmul.u32.u64.high %v841_v36, %v87_v61, %v909_v1  ;;  %v156_v3 = vsel %vm155_vm11, %v848_v48, 0  ;;  %v152_v6 = vor.u32 8388608, %v151_v59 }
  0xa5   :  { %v913_v4 = vshrl.u32 %v309_v60, 30  ;;  %v158_v5 = vand.u32 31, %v156_v3  ;;  %v95_v12 = vmul.u32 %v841_v36, %v79_v0  ;;  %v98_v13 = vadd.s32 1, %v903_v63 }
  0xa6   :  { %vm97_vm12 = vc.u32 %v910_v2, %v902_v62  ;;  %v157_v34 = vshrl.u32 %v156_v3, 5  ;;  %v304_v3 = vadd.s32 %v875_v22, %v872_v21  ;;  %vm250_vm4 = vcmp.lt.s32.totalorder %v821_v7, 0 }
  0xa7   :  { %v311_v10 = vshll.u32 %v913_v4, 30  ;;  %v159_v14 = vsub.s32 32, %v158_v5  ;;  %v161_v16 = vshll.u32 %v784_v38, %v158_v5  ;;  %v164_v17 = vshll.u32 %v785_v40, %v158_v5 }
  0xa8   :  { %v99_v18 = vsel %vm97_vm12, %v98_v13, %v903_v63  ;;  %v167_v20 = vshll.u32 %v786_v42, %v158_v5  ;;  %v170_v25 = vshll.u32 %v787_v44, %v158_v5  ;;  %v173_v29 = vshll.u32 %v788_v46, %v158_v5 }
  0xa9   :  { %v312_v48 = vsub.s32 %v308_v52, %v311_v10  ;;  %v162_v19 = vshrl.u32 %v785_v40, %v159_v14  ;;  %v100_v23 = vadd.s32 %v99_v18, %v95_v12  ;;  %v165_v36 = vshrl.u32 %v786_v42, %v159_v14 }
  0xaa   :  { %v168_v24 = vshrl.u32 %v787_v44, %v159_v14  ;;  %v171_v28 = vshrl.u32 %v788_v46, %v159_v14  ;;  %v174_v40 = vshrl.u32 %v789_v54, %v159_v14  ;;  %v160_v41 = vshrl.u32 %v784_v38, %v159_v14 }
  0xab   :  { %v314_v26 = vsub.s32 0, %v312_v48  ;;  %v163_v27 = vor.u32 %v162_v19, %v161_v16  ;;  %v101_v30 = vadd.s32 536870912, %v100_v23  ;;  %v166_v31 = vor.u32 %v165_v36, %v164_v17 }
  0xac   :  { %v169_v37 = vor.u32 %v168_v24, %v167_v20  ;;  %v172_v43 = vor.u32 %v171_v28, %v170_v25  ;;  %v192_v42 = vshll.u32 %v152_v6, 8  ;;  %v175_v45 = vor.u32 %v174_v40, %v173_v29 }
  0xad   :  { %v707_v39 = vmin.u32 %v314_v26, %v312_v48  ;;  %v932_v33 = vshrl.u32 %v101_v30, 30  ;;  %vm176_vm13 = vcmp.lt.s32.totalorder %v157_v34, 1  ;;  %vm179_vm14 = vcmp.lt.s32.totalorder %v157_v34, 4 }
  0xae   :  { %vm177_vm15 = vcmp.lt.s32.totalorder %v157_v34, 2  ;;  %v181_v47 = vsel %vm179_vm14, %v169_v37, 2102212464  ;;  %v184_v49 = vsel %vm176_vm13, %v163_v27, %v166_v31  ;;  %vm178_vm0 = vcmp.lt.s32.totalorder %v157_v34, 3 }
  0xaf   :  { %v316_v44 = vclz %v707_v39  ;;  %v103_v46 = vshll.u32 %v932_v33, 30  ;;  %v185_v35 = vsel %vm179_vm14, %v172_v43, 920167782  ;;  %v188_v50 = vsel %vm176_vm13, %v166_v31, %v169_v37 }
  0xb0   :  { %v180_v51 = vsel %vm176_vm13, %v160_v41, %v163_v27  ;;  %v186_v52 = vsel %vm178_vm0, %v169_v37, %v185_v35  ;;  %v189_v38 = vsel %vm179_vm14, %v175_v45, 1326507024  ;;  %v182_v55 = vsel %vm178_vm0, %v166_v31, %v181_v47 }
  0xb1   :  { %v708_v54 = vadd.s32 4294967294, %v316_v44  ;;  %v104_v53 = vsub.s32 %v100_v23, %v103_v46  ;;  %v187_v56 = vsel %vm177_vm15, %v184_v49, %v186_v52  ;;  %v190_v57 = vsel %vm178_vm0, %v172_v43, %v189_v38 }
  0xb2   :  { %v191_v58 = vsel %vm177_vm15, %v188_v50, %v190_v57  ;;  %v937_v59 = vmul.u32.u64.low %v192_v42, %v187_v56  ;;  %v938_v60 = vmul.u32.u64.high %v192_v42, %v187_v56, %v937_v59  ;;  %v183_v10 = vsel %vm177_vm15, %v180_v51, %v182_v55 }
  0xb3   :  { %vm709_vm1 = vcmp.lt.s32.totalorder %v708_v54, 0  ;;  %v106_v63 = vsub.s32 0, %v104_v53  ;;  %v941_v0 = vmul.u32.u64.low %v192_v42, %v191_v58  ;;  %v942_v1 = vmul.u32.u64.high %v192_v42, %v191_v58, %v941_v0 }
  0xb4   :  { %v319_v61 = vsel %vm709_vm1, 0, %v708_v54  ;;  %v202_v17 = vadd.s32 1, %v938_v60  ;;  %v199_v19 = vmul.u32 %v192_v42, %v183_v10  ;;  %v96_v26 = vadd.s32 %v902_v62, %v910_v2 }
  0xb5   :  { %v320_v5 = vsub.s32 32, %v319_v61  ;;  %v324_v6 = vsub.s32 4294967266, %v319_v61  ;;  %v699_v12 = vmin.u32 %v106_v63, %v104_v53  ;;  %v321_v13 = vshll.u32 %v312_v48, %v319_v61 }
  0xb6   :  { %vm201_vm2 = vc.u32 %v942_v1, %v937_v59  ;;  %v334_v31 = vsub.s32 4, %v913_v4  ;;  %vm249_vm5 = vcmp.le.f32.partialorder %v248_v9, 0.7853982  ;;  %v126_v50 = vsub.s32 4, %v932_v33 }
  0xb7   :  { %v322_v14 = vshrl.u32 %v304_v3, %v320_v5  ;;  %v325_v16 = vadd.s32 127, %v324_v6  ;;  %v108_v18 = vclz %v699_v12  ;;  %v203_v36 = vsel %vm201_vm2, %v202_v17, %v938_v60 }
  0xb8   :  { %v204_v22 = vadd.s32 %v203_v36, %v199_v19  ;;  %v335_v62 = vsel %vm250_vm4, %v334_v31, %v913_v4  ;;  %vm42_vm6 = vcmp.lt.s32.totalorder %v823_v8, 0  ;;  %vm41_vm7 = vcmp.le.f32.partialorder %v40_v11, 0.7853982 }
  0xb9   :  { %v323_v20 = vor.u32 %v322_v14, %v321_v13  ;;  %v326_v23 = vshll.u32 %v325_v16, 23  ;;  %v700_v21 = vadd.s32 4294967294, %v108_v18  ;;  %v337_v54 = vsel %vm249_vm5, 0, %v335_v62 }
  0xba   :  { %v205_v34 = vadd.s32 536870912, %v204_v22  ;;  %v127_v55 = vsel %vm42_vm6, %v126_v50, %v932_v33  ;;  %v341_v56 = vadd.s32 3, %v337_v54  ;;  %v200_v3 = vadd.s32 %v937_v59, %v942_v1 }
  0xbb   :  { %v327_v24 = vor.u32 4788187, %v326_v23  ;;  %vm701_vm3 = vcmp.lt.s32.totalorder %v700_v21, 0  ;;  %v330_v48 = vcvt.s32.f32 %v323_v20  ;;  %v129_v60 = vsel %vm41_vm7, 0, %v127_v55 }
  0xbc   :  { %v111_v27 = vsel %vm701_vm3, 0, %v700_v21  ;;  %v953_v30 = vshrl.u32 %v205_v34, 30  ;;  %v342_v0 = vand.u32 3, %v341_v56  ;;  %v133_v10 = vadd.s32 3, %v129_v60 }
  0xbd   :  { %v328_v25 = vand.u32 2147483647, %v327_v24  ;;  %v112_v28 = vsub.s32 32, %v111_v27  ;;  %v116_v29 = vsub.s32 4294967266, %v111_v27  ;;  %v113_v40 = vshll.u32 %v104_v53, %v111_v27 }
  0xbe   :  { %v207_v43 = vshll.u32 %v953_v30, 30  ;;  %vm347_vm9 = vcmp.eq.s32.totalorder %v342_v0, 2  ;;  %vm344_vm10 = vcmp.eq.s32.totalorder %v342_v0, 0  ;;  %vm340_vm11 = vweird.f32 %v821_v7 }
  0xbf   :  { %v331_v37 = vmul.f32 %v330_v48, %v328_v25  ;;  %v114_v39 = vshrl.u32 %v96_v26, %v112_v28  ;;  %v117_v41 = vadd.s32 127, %v116_v29  ;;  %vm343_vm12 = vcmp.lt.s32.totalorder %v342_v0, 2 }
  0xc0   :  { %v208_v47 = vsub.s32 %v204_v22, %v207_v43  ;;  %vm352_vm13 = vcmask 130048   ;;  %v134_v23 = vand.u32 3, %v133_v10  ;;  %v449_v36 = vand.u32 3, %v129_v60 }
  0xc1   :  { %v332_v42 = vxor.u32 2147483648, %v331_v37  ;;  %v115_v45 = vor.u32 %v114_v39, %v113_v40  ;;  %v118_v44 = vshll.u32 %v117_v41, 23  ;;  %v655_v25 = vand.u32 3, %v337_v54 }
  0xc2   :  { %v210_v46 = vsub.s32 0, %v208_v47  ;;  %vm146_vm14 = vcmp.lt.s32.totalorder %v829_v15, 0  ;;  %vm977_vm15 = vcmp.le.f32.partialorder %v144_v32, 0.7853982  ;;  %v230_v26 = vsub.s32 4, %v953_v30 }
  0xc3   :  { %v333_v2 = vsel %vm250_vm4, %v332_v42, %v331_v37  ;;  %v119_v49 = vor.u32 4788187, %v118_v44  ;;  %v122_v52 = vcvt.s32.f32 %v115_v45  ;;  %vm135_vm0 = vcmp.lt.s32.totalorder %v134_v23, 2 }
  0xc4   :  { %v336_v35 = vsel %vm249_vm5, %v821_v7, %v333_v2  ;;  %v703_v38 = vmin.u32 %v210_v46, %v208_v47  ;;  %vm450_vm1 = vcmp.lt.s32.totalorder %v449_v36, 2  ;;  %vm451_vm2 = vcmp.eq.s32.totalorder %v449_v36, 0 }
  0xc5   :  { %747 = vcosq.f32 %v336_v35  ;;  %v120_v51 = vand.u32 2147483647, %v119_v49  ;;  %vm136_vm3 = vcmp.eq.s32.totalorder %v134_v23, 0  ;;  %vm139_vm4 = vcmp.eq.s32.totalorder %v134_v23, 2 }
  0xc6   :  { %749 = vsinq.f32 %v336_v35  ;;  %v212_v4 = vclz %v703_v38  ;;  %vm454_vm5 = vcmp.eq.s32.totalorder %v449_v36, 2  ;;  %v231_v43 = vsel %vm146_vm14, %v230_v26, %v953_v30 }
  0xc7   :  { %v123_v53 = vmul.f32 %v122_v52, %v120_v51  ;;  %v233_v50 = vsel %vm977_vm15, 0, %v231_v43 }
  0xc8   :  { %v704_v57 = vadd.s32 4294967294, %v212_v4  ;;  %v237_v54 = vadd.s32 3, %v233_v50  ;;  %v552_v52 = vand.u32 3, %v233_v50 }
  0xc9   :  { %v124_v9 = vxor.u32 2147483648, %v123_v53 }
  0xca   :  { %vm705_vm8 = vcmp.lt.s32.totalorder %v704_v57, 0  ;;  %v238_v51 = vand.u32 3, %v237_v54 }
  0xcb   :  { %v125_v58 = vsel %vm42_vm6, %v124_v9, %v123_v53  ;;  %v215_v61 = vsel %vm705_vm8, 0, %v704_v57  ;;  %vm657_vm6 = vcmp.eq.s32.totalorder %v655_v25, 0  ;;  %vm132_vm8 = vweird.f32 %v823_v8 }
  0xcc   :  { %v128_v63 = vsel %vm41_vm7, %v823_v8, %v125_v58  ;;  %v216_v5 = vsub.s32 32, %v215_v61  ;;  %v220_v6 = vsub.s32 4294967266, %v215_v61  ;;  %v217_v13 = vshll.u32 %v208_v47, %v215_v61 }
  0xcd   :  { %751 = vcosq.f32 %v128_v63  ;;  %vm660_vm7 = vcmp.eq.s32.totalorder %v655_v25, 2 }
  0xce   :  { %753 = vsinq.f32 %v128_v63  ;;  %v218_v14 = vshrl.u32 %v200_v3, %v216_v5  ;;  %v221_v11 = vadd.s32 127, %v220_v6 }
  0xcf   :  { %v748_v33 = vpop.eup %747 }
  0xd0   :  { %v750_v12 = vpop.eup %749  ;;  %v348_v16 = vxor.u32 2147483648, %v748_v33  ;;  %v219_v18 = vor.u32 %v218_v14, %v217_v13  ;;  %v222_v19 = vshll.u32 %v221_v11, 23 }
  0xd1   :  { %v345_v17 = vxor.u32 2147483648, %v750_v12 }
  0xd2   :  { %v349_v20 = vsel %vm347_vm9, %v348_v16, %v750_v12  ;;  %v223_v1 = vor.u32 4788187, %v222_v19  ;;  %v226_v34 = vcvt.s32.f32 %v219_v18  ;;  %v662_v41 = vsel %vm660_vm7, %v348_v16, %v750_v12 }
  0xd3   :  { %v346_v59 = vsel %vm344_vm10, %v748_v33, %v345_v17  ;;  %v659_v47 = vsel %vm657_vm6, %v748_v33, %v345_v17  ;;  %vm656_vm9 = vcmp.lt.s32.totalorder %v655_v25, 2  ;;  %vm243_vm10 = vcmp.eq.s32.totalorder %v238_v51, 2 }
  0xd4   :  { %v350_v21 = vsel %vm343_vm12, %v346_v59, %v349_v20  ;;  %v224_v24 = vand.u32 2147483647, %v223_v1  ;;  %v663_v30 = vsel %vm656_vm9, %v659_v47, %v662_v41  ;;  %vm557_vm12 = vcmp.eq.s32.totalorder %v552_v52, 2 }
  0xd5   :  { %v351_v22 = vsel %vm340_vm11, nan, %v350_v21  ;;  %v664_v8 = vsel %vm340_vm11, nan, %v663_v30  ;;  %vm236_vm11 = vweird.f32 %v829_v15 }
  0xd6   :  { %355 = vst.msk [vmem:[#allocation2 + $0x10] sm:$0xff] %vm352_vm13, %v351_v22  ;;  %v227_v28 = vmul.f32 %v226_v34, %v224_v24 }
  0xd7   :  { %v752_v27 = vpop.eup %751 }
  0xd8   :  { %v754_v29 = vpop.eup %753  ;;  %v140_v31 = vxor.u32 2147483648, %v752_v27  ;;  %v228_v37 = vxor.u32 2147483648, %v227_v28 }
  0xd9   :  { %v137_v40 = vxor.u32 2147483648, %v754_v29 }
  0xda   :  { %v456_v32 = vsel %vm454_vm5, %v140_v31, %v754_v29  ;;  %v141_v39 = vsel %vm139_vm4, %v140_v31, %v754_v29  ;;  %v229_v42 = vsel %vm146_vm14, %v228_v37, %v227_v28  ;;  %vm240_vm14 = vcmp.eq.s32.totalorder %v238_v51, 0 }
  0xdb   :  { %v453_v45 = vsel %vm451_vm2, %v752_v27, %v137_v40  ;;  %v138_v44 = vsel %vm136_vm3, %v752_v27, %v137_v40  ;;  %v232_v49 = vsel %vm977_vm15, %v829_v15, %v229_v42  ;;  %vm239_vm15 = vcmp.lt.s32.totalorder %v238_v51, 2 }
  0xdc   :  { %v457_v62 = vsel %vm450_vm1, %v453_v45, %v456_v32  ;;  %v142_v2 = vsel %vm135_vm0, %v138_v44, %v141_v39  ;;  %755 = vcosq.f32 %v232_v49  ;;  %vm554_vm0 = vcmp.eq.s32.totalorder %v552_v52, 0 }
  0xdd   :  { %v458_v46 = vsel %vm132_vm8, nan, %v457_v62  ;;  %v143_v35 = vsel %vm132_vm8, nan, %v142_v2  ;;  %757 = vsinq.f32 %v232_v49  ;;  %vm553_vm1 = vcmp.lt.s32.totalorder %v552_v52, 2 }
  0xde   :  { %668 = vrot.lane.b32.xlu1 %v458_v46, %s790_s0  ;;  %353 = vst.msk [vmem:[#allocation2] sm:$0xff] %vm352_vm13, %v143_v35  ;;  %vm677_vm2 = vcmask 261248  }
  0xe2   :  { %672 = vrot.lane.b32.xlu1 %v664_v8, %s790_s0 }
  0xe6   :  { %v756_v38 = vpop.eup %755 }
  0xe7   :  { %v758_v53 = vpop.eup %757  ;;  %v244_v4 = vxor.u32 2147483648, %v756_v38 }
  0xe8   :  { %v241_v55 = vxor.u32 2147483648, %v758_v53 }
  0xe9   :  { %v559_v56 = vsel %vm557_vm12, %v244_v4, %v758_v53  ;;  %v245_v9 = vsel %vm243_vm10, %v244_v4, %v758_v53 }
  0xea   :  { %v556_v57 = vsel %vm554_vm0, %v756_v38, %v241_v55  ;;  %v242_v58 = vsel %vm240_vm14, %v756_v38, %v241_v55 }
  0xeb   :  { %v560_v7 = vsel %vm553_vm1, %v556_v57, %v559_v56  ;;  %v246_v60 = vsel %vm239_vm15, %v242_v58, %v245_v9 }
  0xec   :  { %v561_v61 = vsel %vm236_vm11, nan, %v560_v7  ;;  %v247_v63 = vsel %vm236_vm11, nan, %v246_v60 }
  0xed   :  { %670 = vrot.lane.b32.xlu0 %v561_v61, %s790_s0  ;;  %354 = vst.msk [vmem:[#allocation2 + $0x8] sm:$0xff] %vm352_vm13, %v247_v63 }
 0x150   :  { %v669_v0 = vpop.permute.xlu1 %668 }
 0x151   :  { %678 = vst.msk [vmem:[#allocation2] sm:$0xff] %vm677_vm2, %v669_v0 }
 0x154   :  { %v673_v3 = vpop.permute.xlu1 %672 }
 0x155   :  { %680 = vst.msk [vmem:[#allocation2 + $0x10] sm:$0xff] %vm677_vm2, %v673_v3 }
 0x15f   :  { %v671_v5 = vpop.permute.xlu0 %670 }
 0x160   :  { %679 = vst.msk [vmem:[#allocation2 + $0x8] sm:$0xff] %vm677_vm2, %v671_v5 }
 0x161   :  { %770 = shalt.err (!%p767_p4)
}
 0x162   :  { %s771_s21 = scalar_lea.hbm %s1014_s2, 384 }
 0x163   :  { %p772_p5 = scmp.ne.s32.totalorder %s1014_s2, %s771_s21  ;;  %p775_p6 = scmp.lt.u32.totalorder %s771_s21, %s1014_s2 }
 0x165   :  { %p777_p7 = pnand %p775_p6, %p772_p5 }
 0x167   :  { %780 = shalt.err (!%p777_p7)
}
 0x168   :  { %s792_s26 = smov 128   ;;  %s793_s27 = smov 8  }
 0x169   :  { %692 = dma.vmem_to_hbm [thread:$0]  %s687_s17, 384, %s1014_s2, [#allocation3], %s792_s26, %s792_s26, %s793_s27  }
 0x16a   :  { %781 = dma.done.wait [#allocation3], 384  }
 0x16b   :  { %782 = vsyncadd [#allocation3], 4294966912 }
 0x16c   :  { %696 = vsyncpa [#allocation3], 1 }

</bundles_post_ra>
